<compile_context>
chip_gen: v7x
topology: tpu7x:2x2x1
jax: 0.10.0
libtpu: 0.0.40
codegen_flags: <defaults>
</compile_context>

<pallas_src>
import math

import jax
import jax.numpy as jnp
from jax.experimental import pallas as pl
from jax.experimental.pallas import tpu as pltpu


def _addn_kernel(x_ref, out_ref, acc_ref):
    """One (tile_b, tile_s, *rest) block: accumulate the S-sum, finalize the L2 norm."""
    ks = pl.program_id(1)

    @pl.when(ks == 0)
    def _init():
        acc_ref[...] = jnp.zeros_like(acc_ref)

    # Widen to f32 inside the reduction -- no materialized f32 copy of the tile.
    acc_ref[...] += jnp.sum(x_ref[...], axis=1, dtype=jnp.float32)

    @pl.when(ks == pl.num_programs(1) - 1)
    def _finalize():
        s = acc_ref[...]
        ss = jnp.sum(s * s, axis=-1, keepdims=True)
        # rsqrt(max(ss, eps^2)) == 1 / max(sqrt(ss), eps)  (F.normalize semantics),
        # one EUP op instead of sqrt + divide.
        inv = jax.lax.rsqrt(jnp.maximum(ss, 1e-24))
        out_ref[...] = (s * inv).astype(out_ref.dtype)


def _pick_tiles(shape, itemsize, block_budget):
    """Choose (tile_b, tile_s) so one input block stays within block_budget bytes."""
    B, S = int(shape[0]), int(shape[1])
    rest = tuple(int(d) for d in shape[2:])
    rest_elems = math.prod(rest)
    rank3 = len(shape) == 3  # then S / tile_b sit on a sublane axis of in/out blocks

    # Preferred: keep the full reduced axis S in each block, tile only the batch.
    full_s_row = S * rest_elems * itemsize
    tile_b = min(B, max(block_budget // full_s_row, 0))
    if rank3 and 0 < tile_b < B:
        tile_b = (tile_b // 8) * 8          # (8, 128) sublane rule on the output block
    if tile_b > 0:
        return tile_b, S

    # Fallback: also tile S (streaming f32 accumulator over the reduced axis).
    tile_b = min(B, 8)

    def s_ok(t):
        return S % t == 0 and (not rank3 or t == S or t % 8 == 0)

    tile_s = None
    for t in range(S, 0, -1):
        if s_ok(t) and tile_b * t * rest_elems * itemsize <= block_budget:
            tile_s = t
            break
    if tile_s is None:                      # budget unreachable: smallest legal tile
        tile_s = next(t for t in range(1, S + 1) if s_ok(t))
    return tile_b, tile_s


def addn_forward(x, *, block_budget=8 * 1024 * 1024):
    """Pallas equivalent of ADDN.forward: F.normalize(x.sum(axis=1), axis=-1)."""
    if x.ndim < 3:
        raise ValueError("ADDN kernel expects rank >= 3 input "
                         "(sum over dim=1, L2-normalize over the last dim).")
    shape = x.shape
    B, S = shape[0], shape[1]
    rest = shape[2:]
    n_rest = len(rest)
    itemsize = jnp.dtype(x.dtype).itemsize

    tile_b, tile_s = _pick_tiles(shape, itemsize, block_budget)
    grid = (pl.cdiv(B, tile_b), S // tile_s)

    # Never split the last (lane) dim: keeps the output store unmasked and the
    # L2 normalize a single-pass epilogue.
    in_spec = pl.BlockSpec((tile_b, tile_s) + rest,
                           lambda i, k: (i, k) + (0,) * n_rest)
    out_spec = pl.BlockSpec((tile_b,) + rest,
                            lambda i, k: (i,) + (0,) * n_rest)

    out_elems = B * math.prod(rest)
    cost = pl.CostEstimate(
        flops=B * S * math.prod(rest) + 3 * out_elems,
        transcendentals=out_elems // rest[-1],
        bytes_accessed=x.size * itemsize + out_elems * itemsize,
    )

    return pl.pallas_call(
        _addn_kernel,
        out_shape=jax.ShapeDtypeStruct((B,) + rest, x.dtype),
        grid_spec=pltpu.PrefetchScalarGridSpec(
            num_scalar_prefetch=0,
            grid=grid,
            in_specs=[in_spec],
            out_specs=out_spec,
            scratch_shapes=[pltpu.VMEM((tile_b,) + rest, jnp.float32)],
        ),
        compiler_params=pltpu.CompilerParams(
            dimension_semantics=("parallel", "arbitrary"),
            vmem_limit_bytes=64 << 20,
        ),
        cost_estimate=cost,
    )(x)


if __name__ == "__main__":
    # Small, deterministic example: batch=16, reduce (seq) dim=16, hidden=256.
    B, S, D = 16, 16, 256
    key = jax.random.PRNGKey(0)
    x = jax.random.normal(key, (B, S, D), jnp.float32)

    def ref_fn(v):
        s = jnp.sum(v.astype(jnp.float32), axis=1)
        n = jnp.sqrt(jnp.sum(s * s, axis=-1, keepdims=True))
        return (s / jnp.maximum(n, 1e-12)).astype(v.dtype)

    ref = ref_fn(x)

    # 1) Default path: whole (tiny) arrays resident in VMEM, grid = (1, 1).
    out = jax.jit(addn_forward)(x)
    jax.block_until_ready(out)
    assert out.shape == (B, D)
    assert bool(jnp.all(jnp.isfinite(out)))
    assert bool(jnp.max(jnp.abs(out - ref)) < 1e-5)

    # 2) Force a (B, S) grid with a small per-block budget to exercise the
    #    streaming-accumulator path that large inputs would take.
    out_tiled = jax.jit(lambda v: addn_forward(v, block_budget=96 * 1024))(x)
    jax.block_until_ready(out_tiled)
    assert out_tiled.shape == (B, D)
    assert bool(jnp.max(jnp.abs(out_tiled - ref)) < 1e-5)

    print("KERNEL_OK")
</pallas_src>

<mosaic_0001>
module attributes {stable_mosaic.version = 11 : i64} {
  func.func @_addn_kernel(%arg0: i32, %arg1: i32, %arg2: memref<16x16x256xf32, #tpu.memory_space<vmem>>, %arg3: memref<16x256xf32, #tpu.memory_space<vmem>>, %arg4: memref<16x256xf32, #tpu.memory_space<vmem>>) attributes {dimension_semantics = [#tpu.dimension_semantics<parallel>, #tpu.dimension_semantics<arbitrary>], iteration_bounds = array<i64: 1, 1>, scalar_prefetch = 0 : i64, scratch_operands = 1 : i64, tpu.core_type = #tpu.core_type<tc>, window_params = [{transform_indices = @transform_0, window_bounds = array<i64: 16, 16, 256>}, {transform_indices = @transform_1, window_bounds = array<i64: 16, 256>}]} {
    %c0_i32 = arith.constant 0 : i32
    %0 = arith.cmpi eq, %arg1, %c0_i32 : i32
    %1 = arith.extui %0 : i1 to i32
    %c0_i32_0 = arith.constant 0 : i32
    %2 = arith.cmpi ne, %1, %c0_i32_0 : i32
    scf.if %2 {
      %cst_9 = arith.constant 0.000000e+00 : f32
      %11 = vector.broadcast %cst_9 : f32 to vector<16x256xf32>
      %c0_10 = arith.constant 0 : index
      %c0_11 = arith.constant 0 : index
      %12 = vector.load %arg4[%c0_10, %c0_11] : memref<16x256xf32, #tpu.memory_space<vmem>>, vector<16x256xf32>
      tpu.vector_store %arg4[%c0_10, %c0_11], %11 {strides = array<i32>} : memref<16x256xf32, #tpu.memory_space<vmem>>, vector<16x256xf32>,
    } else {
    }
    %c0 = arith.constant 0 : index
    %c0_1 = arith.constant 0 : index
    %3 = vector.load %arg4[%c0, %c0_1] : memref<16x256xf32, #tpu.memory_space<vmem>>, vector<16x256xf32>
    %c0_2 = arith.constant 0 : index
    %c0_3 = arith.constant 0 : index
    %c0_4 = arith.constant 0 : index
    %4 = vector.load %arg2[%c0_2, %c0_3, %c0_4] : memref<16x16x256xf32, #tpu.memory_space<vmem>>, vector<16x16x256xf32>
    %cst = arith.constant dense<0.000000e+00> : vector<16x256xf32>
    %5 = vector.multi_reduction <add>, %4, %cst [1] : vector<16x16x256xf32> to vector<16x256xf32>
    %6 = arith.addf %3, %5 : vector<16x256xf32>
    %c0_5 = arith.constant 0 : index
    %c0_6 = arith.constant 0 : index
    %7 = vector.load %arg4[%c0_5, %c0_6] : memref<16x256xf32, #tpu.memory_space<vmem>>, vector<16x256xf32>
    tpu.vector_store %arg4[%c0_5, %c0_6], %6 {strides = array<i32>} : memref<16x256xf32, #tpu.memory_space<vmem>>, vector<16x256xf32>,
    %c0_i32_7 = arith.constant 0 : i32
    %8 = arith.cmpi eq, %arg1, %c0_i32_7 : i32
    %9 = arith.extui %8 : i1 to i32
    %c0_i32_8 = arith.constant 0 : i32
    %10 = arith.cmpi ne, %9, %c0_i32_8 : i32
    scf.if %10 {
      %c0_9 = arith.constant 0 : index
      %c0_10 = arith.constant 0 : index
      %11 = vector.load %arg4[%c0_9, %c0_10] : memref<16x256xf32, #tpu.memory_space<vmem>>, vector<16x256xf32>
      %12 = arith.mulf %11, %11 : vector<16x256xf32>
      %cst_11 = arith.constant dense<0.000000e+00> : vector<16xf32>
      %13 = vector.multi_reduction <add>, %12, %cst_11 [1] : vector<16x256xf32> to vector<16xf32>
      %14 = vector.shape_cast %13 : vector<16xf32> to vector<16x1xf32>
      %cst_12 = arith.constant 1.000000e-24 : f32
      %15 = vector.broadcast %cst_12 : f32 to vector<16x1xf32>
      %16 = arith.maximumf %14, %15 : vector<16x1xf32>
      %17 = math.rsqrt %16 : vector<16x1xf32>
      %18 = vector.broadcast %17 : vector<16x1xf32> to vector<16x256xf32>
      %19 = arith.mulf %11, %18 : vector<16x256xf32>
      %c0_13 = arith.constant 0 : index
      %c0_14 = arith.constant 0 : index
      %20 = vector.load %arg3[%c0_13, %c0_14] : memref<16x256xf32, #tpu.memory_space<vmem>>, vector<16x256xf32>
      tpu.vector_store %arg3[%c0_13, %c0_14], %19 {strides = array<i32>} : memref<16x256xf32, #tpu.memory_space<vmem>>, vector<16x256xf32>,
    } else {
    }
    return
  }
  func.func @transform_0(%arg0: i32, %arg1: i32) -> (i32, i32, i32) {
    %c0_i32 = arith.constant 0 : i32
    %c0_i32_0 = arith.constant 0 : i32
    return %arg0, %arg1, %c0_i32 : i32, i32, i32
  }
  func.func @transform_1(%arg0: i32, %arg1: i32) -> (i32, i32) {
    %c0_i32 = arith.constant 0 : i32
    %c0_i32_0 = arith.constant 0 : i32
    return %arg0, %c0_i32 : i32, i32
  }
}

</mosaic_0001>

<bundles_post_ra>
// kernel: addn_forward.1
= control target key start
LH: loop header
LB: loop body
LE: loop exit
PB: predicated region body
PF: predicated region fallthrough
CT: control target
= control target key end

     0   :  { %6 = vsyncpa [#allocation4], 0  ;;  %s622_s0 = inlined_call_operand.hbm [shape: f32[16,16,256], index: 0, kind: input, shape index: {}]   ;;  %s623_s1 = inlined_call_operand.hbm [shape: f32[16,256], index: 1, kind: output, shape index: {}]  }
   0x1   :  { %7 = vsyncpa [#allocation5], 0  ;;  %s504_s6 = smov [#allocation3]   ;;  %s456_s10 = scalar_lea.hbm %s622_s0, 8192 }
   0x2   :  { %s13_s7 = sshll.u32 %s504_s6, 4  ;;  %p457_p0 = scmp.ne.s32.totalorder %s622_s0, %s456_s10  ;;  %s14_s7 = int_to_ptr.vmem [resolvable:$true] %s13_s7 }
   0x3   :  { %p460_p1 = scmp.lt.u32.totalorder %s456_s10, %s622_s0 }
   0x5   :  { %p462_p2 = pnand %p460_p1, %p457_p0 }
   0x7   :  { %465 = shalt.err (!%p462_p2)
}
   0x8   :  { %s466_s15 = scalar_lea.vmem %s14_s7, 8192  ;;  %p471_p4 = scmp.lt.s32.totalorder %s14_s7, %s14_s7 }
   0x9   :  { %p467_p3 = scmp.ne.s32.totalorder %s14_s7, %s466_s15  ;;  %p472_p5 = scmp.lt.s32.totalorder %s466_s15, %s466_s15 }
   0xb   :  { %p473_p6 = por %p472_p5, %p471_p4 }
   0xd   :  { %p474_p7 = pnand %p473_p6, %p467_p3 }
   0xf   :  { %477 = shalt.err (!%p474_p7)
}
  0x10   :  { %s505_s16 = smov 256   ;;  %s506_s17 = smov 16  }
  0x11   :  { %19 = dma.hbm_to_vmem [thread:$0]  %s622_s0, 8192, %s14_s7, [#allocation4], %s505_s16, %s505_s16, %s506_s17  }
  0x12   :  { %500 = dma.done.wait [#allocation4], 8192  }
  0x13   :  { %501 = vsyncadd [#allocation4], 4294959104  ;;  %v35_v0 = vld [vmem:[#allocation3] sm:$0xff]  ;;  %v36_v1 = vld [vmem:[#allocation3 + $0x8] sm:$0xff]  ;;  %vm355_vm0 = vcmask 1041409   ;;  %vm357_vm1 = vcmask 1042434  }
  0x14   :  { %v37_v2 = vld [vmem:[#allocation3 + $0x10] sm:$0xff]  ;;  %v38_v3 = vld [vmem:[#allocation3 + $0x18] sm:$0xff]  ;;  %v39_v4 = vld [vmem:[#allocation3 + $0x20] sm:$0xff]  ;;  %vm359_vm2 = vcmask 1043459   ;;  %vm361_vm3 = vcmask 1044484   ;;  %vm363_vm4 = vcmask 1045509  }
  0x15   :  { %v40_v5 = vld [vmem:[#allocation3 + $0x28] sm:$0xff]  ;;  %v99_v6 = vadd.f32 %v37_v2, %v35_v0  ;;  %v41_v7 = vld [vmem:[#allocation3 + $0x30] sm:$0xff]  ;;  %v42_v8 = vld [vmem:[#allocation3 + $0x38] sm:$0xff]  ;;  %v106_v10 = vadd.f32 %v38_v3, %v36_v1  ;;  %vm365_vm5 = vcmask 1046534   ;;  %vm367_vm6 = vcmask 1047559   ;;  %s507_s0 = smov [#allocation6]  }
  0x16   :  { %v43_v9 = vld [vmem:[#allocation3 + $0x40] sm:$0xff]  ;;  %v44_v11 = vld [vmem:[#allocation3 + $0x48] sm:$0xff]  ;;  %v45_v12 = vld [vmem:[#allocation3 + $0x50] sm:$0xff]  ;;  %v113_v15 = vadd.f32 %v41_v7, %v39_v4  ;;  %v120_v16 = vadd.f32 %v42_v8, %v40_v5  ;;  %s436_s20 = sshll.u32 %s507_s0, 4  ;;  %s437_s20 = int_to_ptr.vmem [resolvable:$true] %s436_s20 }
  0x17   :  { %v46_v13 = vld [vmem:[#allocation3 + $0x58] sm:$0xff]  ;;  %v100_v14 = vrot.slane %v99_v6, 4  ;;  %v47_v17 = vld [vmem:[#allocation3 + $0x60] sm:$0xff]  ;;  %v48_v18 = vld [vmem:[#allocation3 + $0x68] sm:$0xff]  ;;  %v107_v20 = vrot.slane %v106_v10, 4  ;;  %v127_v21 = vadd.f32 %v45_v12, %v43_v9  ;;  %s478_s21 = scalar_lea.vmem %s437_s20, 512  ;;  %p483_p9 = scmp.lt.s32.totalorder %s437_s20, %s437_s20 }
  0x18   :  { %v49_v19 = vld [vmem:[#allocation3 + $0x70] sm:$0xff]  ;;  %v134_v22 = vadd.f32 %v46_v13, %v44_v11  ;;  %v50_v23 = vld [vmem:[#allocation3 + $0x78] sm:$0xff]  ;;  %v114_v25 = vrot.slane %v113_v15, 4  ;;  %v121_v26 = vrot.slane %v120_v16, 4  ;;  %v51_v52 = vld [vmem:[#allocation3 + $0x80] sm:$0xff]  ;;  %p479_p8 = scmp.ne.s32.totalorder %s437_s20, %s478_s21  ;;  %p484_p10 = scmp.lt.s32.totalorder %s478_s21, %s478_s21 }
  0x19   :  { %v101_v24 = vadd.f32 %v100_v14, %v99_v6  ;;  %v141_v27 = vadd.f32 %v49_v19, %v47_v17  ;;  %v108_v28 = vadd.f32 %v107_v20, %v106_v10  ;;  %v128_v29 = vrot.slane %v127_v21, 4  ;;  %v52_v53 = vld [vmem:[#allocation3 + $0x88] sm:$0xff]  ;;  %v53_v54 = vld [vmem:[#allocation3 + $0x90] sm:$0xff]  ;;  %v54_v59 = vld [vmem:[#allocation3 + $0x98] sm:$0xff] }
  0x1a   :  { %v135_v30 = vrot.slane %v134_v22, 4  ;;  %v148_v31 = vadd.f32 %v50_v23, %v48_v18  ;;  %v115_v33 = vadd.f32 %v114_v25, %v113_v15  ;;  %v122_v34 = vadd.f32 %v121_v26, %v120_v16  ;;  %v55_v60 = vld [vmem:[#allocation3 + $0xa0] sm:$0xff]  ;;  %v56_v61 = vld [vmem:[#allocation3 + $0xa8] sm:$0xff]  ;;  %v57_v2 = vld [vmem:[#allocation3 + $0xb0] sm:$0xff]  ;;  %p485_p11 = por %p484_p10, %p483_p9 }
  0x1b   :  { %v102_v32 = vrot.slane %v101_v24, 2  ;;  %v142_v35 = vrot.slane %v141_v27, 4  ;;  %v109_v36 = vrot.slane %v108_v28, 2  ;;  %v129_v37 = vadd.f32 %v128_v29, %v127_v21  ;;  %v58_v3 = vld [vmem:[#allocation3 + $0xb8] sm:$0xff]  ;;  %v59_v4 = vld [vmem:[#allocation3 + $0xc0] sm:$0xff]  ;;  %v60_v9 = vld [vmem:[#allocation3 + $0xc8] sm:$0xff] }
  0x1c   :  { %v136_v38 = vadd.f32 %v135_v30, %v134_v22  ;;  %v149_v39 = vrot.slane %v148_v31, 4  ;;  %v116_v41 = vrot.slane %v115_v33, 2  ;;  %v123_v42 = vrot.slane %v122_v34, 2  ;;  %v61_v10 = vld [vmem:[#allocation3 + $0xd0] sm:$0xff]  ;;  %v62_v11 = vld [vmem:[#allocation3 + $0xd8] sm:$0xff]  ;;  %v63_v16 = vld [vmem:[#allocation3 + $0xe0] sm:$0xff]  ;;  %p486_p12 = pnand %p485_p11, %p479_p8 }
  0x1d   :  { %v103_v40 = vadd.f32 %v102_v32, %v101_v24  ;;  %v143_v43 = vadd.f32 %v142_v35, %v141_v27  ;;  %v110_v44 = vadd.f32 %v109_v36, %v108_v28  ;;  %v130_v45 = vrot.slane %v129_v37, 2  ;;  %v65_v17 = vld [vmem:[#allocation3 + $0xf0] sm:$0xff]  ;;  %v64_v22 = vld [vmem:[#allocation3 + $0xe8] sm:$0xff]  ;;  %v66_v23 = vld [vmem:[#allocation3 + $0xf8] sm:$0xff] }
  0x1e   :  { %v137_v46 = vrot.slane %v136_v38, 2  ;;  %v150_v47 = vadd.f32 %v149_v39, %v148_v31  ;;  %v117_v49 = vadd.f32 %v116_v41, %v115_v33  ;;  %v124_v50 = vadd.f32 %v123_v42, %v122_v34 }
  0x1f   :  { %v104_v48 = vrot.slane %v103_v40, 1  ;;  %v144_v51 = vrot.slane %v143_v43, 2  ;;  %v111_v55 = vrot.slane %v110_v44, 1  ;;  %v131_v56 = vadd.f32 %v130_v45, %v129_v37 }
  0x20   :  { %v138_v57 = vadd.f32 %v137_v46, %v136_v38  ;;  %v151_v58 = vrot.slane %v150_v47, 2  ;;  %v118_v63 = vrot.slane %v117_v49, 1  ;;  %v125_v0 = vrot.slane %v124_v50, 1 }
  0x21   :  { %v533_v62 = vadd.f32 %v104_v48, %v103_v40  ;;  %v145_v1 = vadd.f32 %v144_v51, %v143_v43  ;;  %v535_v5 = vadd.f32 %v111_v55, %v110_v44  ;;  %v132_v6 = vrot.slane %v131_v56, 1 }
  0x22   :  { %v139_v7 = vrot.slane %v138_v57, 1  ;;  %v152_v8 = vadd.f32 %v151_v58, %v150_v47  ;;  %v537_v12 = vadd.f32 %v118_v63, %v117_v49  ;;  %v539_v13 = vadd.f32 %v125_v0, %v124_v50 }
  0x23   :  { %v146_v14 = vrot.slane %v145_v1, 1  ;;  %v155_v15 = vadd.f32 %v53_v54, %v51_v52  ;;  %v541_v18 = vadd.f32 %v132_v6, %v131_v56  ;;  %v162_v21 = vadd.f32 %v54_v59, %v52_v53 }
  0x24   :  { %v543_v19 = vadd.f32 %v139_v7, %v138_v57  ;;  %v153_v20 = vrot.slane %v152_v8, 1  ;;  %v169_v26 = vadd.f32 %v57_v2, %v55_v60  ;;  %v176_v27 = vadd.f32 %v58_v3, %v56_v61 }
  0x25   :  { %v545_v24 = vadd.f32 %v146_v14, %v145_v1  ;;  %v156_v25 = vrot.slane %v155_v15, 4  ;;  %v163_v29 = vrot.slane %v162_v21, 4  ;;  %v183_v30 = vadd.f32 %v61_v10, %v59_v4  ;;  %v67_v10 = vld [vmem:[#allocation3 + $0x100] sm:$0xff] }
  0x26   :  { %v547_v28 = vadd.f32 %v153_v20, %v152_v8  ;;  %v190_v31 = vadd.f32 %v62_v11, %v60_v9  ;;  %v170_v33 = vrot.slane %v169_v26, 4  ;;  %v177_v34 = vrot.slane %v176_v27, 4  ;;  %v69_v11 = vld [vmem:[#allocation3 + $0x110] sm:$0xff]  ;;  %v68_v20 = vld [vmem:[#allocation3 + $0x108] sm:$0xff] }
  0x27   :  { %v157_v32 = vadd.f32 %v156_v25, %v155_v15  ;;  %v197_v35 = vadd.f32 %v65_v17, %v63_v16  ;;  %v164_v36 = vadd.f32 %v163_v29, %v162_v21  ;;  %v184_v37 = vrot.slane %v183_v30, 4  ;;  %v70_v21 = vld [vmem:[#allocation3 + $0x118] sm:$0xff]  ;;  %v73_v29 = vld [vmem:[#allocation3 + $0x130] sm:$0xff] }
  0x28   :  { %v191_v38 = vrot.slane %v190_v31, 4  ;;  %v204_v39 = vadd.f32 %v66_v23, %v64_v22  ;;  %v171_v41 = vadd.f32 %v170_v33, %v169_v26  ;;  %v178_v42 = vadd.f32 %v177_v34, %v176_v27  ;;  %v71_v27 = vld [vmem:[#allocation3 + $0x120] sm:$0xff]  ;;  %v72_v33 = vld [vmem:[#allocation3 + $0x128] sm:$0xff] }
  0x29   :  { %v158_v40 = vrot.slane %v157_v32, 2  ;;  %v198_v43 = vrot.slane %v197_v35, 4  ;;  %v165_v44 = vrot.slane %v164_v36, 2  ;;  %v185_v45 = vadd.f32 %v184_v37, %v183_v30 }
  0x2a   :  { %v192_v46 = vadd.f32 %v191_v38, %v190_v31  ;;  %v205_v47 = vrot.slane %v204_v39, 4  ;;  %v172_v49 = vrot.slane %v171_v41, 2  ;;  %v179_v50 = vrot.slane %v178_v42, 2 }
  0x2b   :  { %v159_v48 = vadd.f32 %v158_v40, %v157_v32  ;;  %v199_v51 = vadd.f32 %v198_v43, %v197_v35  ;;  %v166_v52 = vadd.f32 %v165_v44, %v164_v36  ;;  %v186_v53 = vrot.slane %v185_v45, 2 }
  0x2c   :  { %v193_v54 = vrot.slane %v192_v46, 2  ;;  %v206_v55 = vadd.f32 %v205_v47, %v204_v39  ;;  %v173_v57 = vadd.f32 %v172_v49, %v171_v41  ;;  %v180_v58 = vadd.f32 %v179_v50, %v178_v42  ;;  %v77_v41 = vld [vmem:[#allocation3 + $0x150] sm:$0xff]  ;;  %v79_v50 = vld [vmem:[#allocation3 + $0x160] sm:$0xff] }
  0x2d   :  { %v160_v56 = vrot.slane %v159_v48, 1  ;;  %v200_v59 = vrot.slane %v199_v51, 2  ;;  %v167_v60 = vrot.slane %v166_v52, 1  ;;  %v187_v61 = vadd.f32 %v186_v53, %v185_v45  ;;  %v76_v45 = vld [vmem:[#allocation3 + $0x148] sm:$0xff] }
  0x2e   :  { %v194_v63 = vadd.f32 %v193_v54, %v192_v46  ;;  %v207_v0 = vrot.slane %v206_v55, 2  ;;  %v174_v2 = vrot.slane %v173_v57, 1  ;;  %v181_v3 = vrot.slane %v180_v58, 1  ;;  %v78_v46 = vld [vmem:[#allocation3 + $0x158] sm:$0xff] }
  0x2f   :  { %v161_v1 = vadd.f32 %v160_v56, %v159_v48  ;;  %v201_v4 = vadd.f32 %v200_v59, %v199_v51  ;;  %v168_v6 = vadd.f32 %v167_v60, %v166_v52  ;;  %v188_v7 = vrot.slane %v187_v61, 1  ;;  %v81_v51 = vld [vmem:[#allocation3 + $0x170] sm:$0xff] }
  0x30   :  { %v195_v8 = vrot.slane %v194_v63, 1  ;;  %v208_v9 = vadd.f32 %v207_v0, %v206_v55  ;;  %v175_v14 = vadd.f32 %v174_v2, %v173_v57  ;;  %v182_v15 = vadd.f32 %v181_v3, %v180_v58  ;;  %v82_v0 = vld [vmem:[#allocation3 + $0x178] sm:$0xff] }
  0x31   :  { %v202_v16 = vrot.slane %v201_v4, 1  ;;  %v356_v17 = vsel %vm355_vm0, %v537_v12, %v533_v62  ;;  %v189_v22 = vadd.f32 %v188_v7, %v187_v61  ;;  %v369_v32 = vsel %vm355_vm0, %v539_v13, %v535_v5  ;;  %v74_v62 = vld [vmem:[#allocation3 + $0x138] sm:$0xff]  ;;  %v75_v13 = vld [vmem:[#allocation3 + $0x140] sm:$0xff] }
  0x32   :  { %v196_v23 = vadd.f32 %v195_v8, %v194_v63  ;;  %v209_v25 = vrot.slane %v208_v9, 1  ;;  %v358_v26 = vsel %vm357_vm1, %v541_v18, %v356_v17  ;;  %v211_v12 = vadd.f32 %v69_v11, %v67_v10  ;;  %v80_v63 = vld [vmem:[#allocation3 + $0x168] sm:$0xff]  ;;  %v85_v17 = vld [vmem:[#allocation3 + $0x190] sm:$0xff] }
  0x33   :  { %v203_v30 = vadd.f32 %v202_v16, %v201_v4  ;;  %v360_v31 = vsel %vm359_vm2, %v545_v24, %v358_v26  ;;  %v370_v36 = vsel %vm357_vm1, %v543_v19, %v369_v32  ;;  %v218_v18 = vadd.f32 %v70_v21, %v68_v20  ;;  %v83_v16 = vld [vmem:[#allocation3 + $0x180] sm:$0xff]  ;;  %v86_v26 = vld [vmem:[#allocation3 + $0x198] sm:$0xff] }
  0x34   :  { %v210_v34 = vadd.f32 %v209_v25, %v208_v9  ;;  %v362_v35 = vsel %vm361_vm3, %v161_v1, %v360_v31  ;;  %v371_v38 = vsel %vm359_vm2, %v547_v28, %v370_v36  ;;  %v212_v24 = vrot.slane %v211_v12, 4  ;;  %v84_v25 = vld [vmem:[#allocation3 + $0x188] sm:$0xff]  ;;  %v87_v32 = vld [vmem:[#allocation3 + $0x1a0] sm:$0xff] }
  0x35   :  { %v364_v37 = vsel %vm363_vm4, %v175_v14, %v362_v35  ;;  %v225_v39 = vadd.f32 %v73_v29, %v71_v27  ;;  %v372_v5 = vsel %vm361_vm3, %v168_v6, %v371_v38  ;;  %v219_v42 = vrot.slane %v218_v18, 4  ;;  %v88_v36 = vld [vmem:[#allocation3 + $0x1a8] sm:$0xff] }
  0x36   :  { %v366_v40 = vsel %vm365_vm5, %v189_v22, %v364_v37  ;;  %v232_v43 = vadd.f32 %v74_v62, %v72_v33  ;;  %v373_v19 = vsel %vm363_vm4, %v182_v15, %v372_v5  ;;  %v213_v47 = vadd.f32 %v212_v24, %v211_v12  ;;  %v89_v33 = vld [vmem:[#allocation3 + $0x1b0] sm:$0xff] }
  0x37   :  { %v568_v44 = vsel %vm367_vm6, %v203_v30, %v366_v40  ;;  %v226_v48 = vrot.slane %v225_v39, 4  ;;  %v374_v28 = vsel %vm365_vm5, %v196_v23, %v373_v19  ;;  %v220_v52 = vadd.f32 %v219_v42, %v218_v18  ;;  %v90_v18 = vld [vmem:[#allocation3 + $0x1b8] sm:$0xff] }
  0x38   :  { %v409_v49 = vmul.f32 %v568_v44, %v568_v44  ;;  %v233_v53 = vrot.slane %v232_v43, 4  ;;  %v575_v54 = vsel %vm367_vm6, %v210_v34, %v374_v28  ;;  %v214_v55 = vrot.slane %v213_v47, 2 }
  0x39   :  { %v227_v56 = vadd.f32 %v226_v48, %v225_v39  ;;  %v239_v57 = vadd.f32 %v77_v41, %v75_v13  ;;  %v410_v58 = vmul.f32 %v575_v54, %v575_v54  ;;  %v221_v59 = vrot.slane %v220_v52, 2 }
  0x3a   :  { %v234_v60 = vadd.f32 %v233_v53, %v232_v43  ;;  %v246_v61 = vadd.f32 %v78_v46, %v76_v45  ;;  %v215_v1 = vadd.f32 %v214_v55, %v213_v47  ;;  %v253_v4 = vadd.f32 %v81_v51, %v79_v50  ;;  %v91_v46 = vld [vmem:[#allocation3 + $0x1c0] sm:$0xff]  ;;  %v93_v47 = vld [vmem:[#allocation3 + $0x1d0] sm:$0xff]  ;;  %v92_v51 = vld [vmem:[#allocation3 + $0x1c8] sm:$0xff] }
  0x3b   :  { %v228_v2 = vrot.slane %v227_v56, 2  ;;  %v240_v3 = vrot.slane %v239_v57, 4  ;;  %v413_v6 = vadd.f32 %v410_v58, %v409_v49  ;;  %v222_v7 = vadd.f32 %v221_v59, %v220_v52  ;;  %v94_v52 = vld [vmem:[#allocation3 + $0x1d8] sm:$0xff]  ;;  %v95_v58 = vld [vmem:[#allocation3 + $0x1e0] sm:$0xff]  ;;  %v97_v59 = vld [vmem:[#allocation3 + $0x1f0] sm:$0xff] }
  0x3c   :  { %v235_v8 = vrot.slane %v234_v60, 2  ;;  %v247_v9 = vrot.slane %v246_v61, 4  ;;  %v216_v10 = vrot.slane %v215_v1, 1  ;;  %v254_v15 = vrot.slane %v253_v4, 4 }
  0x3d   :  { %v229_v11 = vadd.f32 %v228_v2, %v227_v56  ;;  %v241_v14 = vadd.f32 %v240_v3, %v239_v57  ;;  %414 = vadd.xlane.f32.xlu0 %v413_v6  ;;  %v223_v20 = vrot.slane %v222_v7, 1  ;;  %v260_v23 = vadd.f32 %v82_v0, %v80_v63 }
  0x3e   :  { %v236_v21 = vadd.f32 %v235_v8, %v234_v60  ;;  %v248_v22 = vadd.f32 %v247_v9, %v246_v61  ;;  %v579_v27 = vadd.f32 %v216_v10, %v215_v1  ;;  %v255_v31 = vadd.f32 %v254_v15, %v253_v4  ;;  %v96_v10 = vld [vmem:[#allocation3 + $0x1e8] sm:$0xff] }
  0x3f   :  { %v230_v29 = vrot.slane %v229_v11, 1  ;;  %v242_v30 = vrot.slane %v241_v14, 2  ;;  %v581_v62 = vadd.f32 %v223_v20, %v222_v7  ;;  %v261_v35 = vrot.slane %v260_v23, 4 }
  0x40   :  { %v237_v12 = vrot.slane %v236_v21, 1  ;;  %v249_v34 = vrot.slane %v248_v22, 2  ;;  %v256_v24 = vrot.slane %v255_v31, 2  ;;  %v267_v39 = vadd.f32 %v85_v17, %v83_v16 }
  0x41   :  { %v583_v37 = vadd.f32 %v230_v29, %v229_v11  ;;  %v243_v38 = vadd.f32 %v242_v30, %v241_v14  ;;  %v262_v13 = vadd.f32 %v261_v35, %v260_v23  ;;  %v274_v41 = vadd.f32 %v86_v26, %v84_v25  ;;  %v98_v11 = vld [vmem:[#allocation3 + $0x1f8] sm:$0xff] }
  0x42   :  { %v585_v40 = vadd.f32 %v237_v12, %v236_v21  ;;  %v250_v5 = vadd.f32 %v249_v34, %v248_v22  ;;  %v257_v43 = vadd.f32 %v256_v24, %v255_v31  ;;  %v268_v19 = vrot.slane %v267_v39, 4 }
  0x43   :  { %v244_v42 = vrot.slane %v243_v38, 1  ;;  %v281_v45 = vadd.f32 %v89_v33, %v87_v32  ;;  %v263_v28 = vrot.slane %v262_v13, 2  ;;  %v275_v49 = vrot.slane %v274_v41, 4 }
  0x44   :  { %v251_v48 = vrot.slane %v250_v5, 1  ;;  %v288_v50 = vadd.f32 %v90_v18, %v88_v36  ;;  %v258_v55 = vrot.slane %v257_v43, 1  ;;  %v269_v56 = vadd.f32 %v268_v19, %v267_v39 }
  0x45   :  { %v245_v53 = vadd.f32 %v244_v42, %v243_v38  ;;  %v282_v57 = vrot.slane %v281_v45, 4  ;;  %v264_v61 = vadd.f32 %v263_v28, %v262_v13  ;;  %v276_v63 = vadd.f32 %v275_v49, %v274_v41 }
  0x46   :  { %v252_v60 = vadd.f32 %v251_v48, %v250_v5  ;;  %v289_v0 = vrot.slane %v288_v50, 4  ;;  %v259_v1 = vadd.f32 %v258_v55, %v257_v43  ;;  %v270_v2 = vrot.slane %v269_v56, 2 }
  0x47   :  { %v283_v3 = vadd.f32 %v282_v57, %v281_v45  ;;  %v295_v4 = vadd.f32 %v93_v47, %v91_v46  ;;  %v265_v6 = vrot.slane %v264_v61, 1  ;;  %v277_v7 = vrot.slane %v276_v63, 2 }
  0x48   :  { %v290_v8 = vadd.f32 %v289_v0, %v288_v50  ;;  %v302_v9 = vadd.f32 %v94_v52, %v92_v51  ;;  %v271_v14 = vadd.f32 %v270_v2, %v269_v56  ;;  %v309_v17 = vadd.f32 %v97_v59, %v95_v58 }
  0x49   :  { %v284_v15 = vrot.slane %v283_v3, 2  ;;  %v296_v16 = vrot.slane %v295_v4, 4  ;;  %v266_v20 = vadd.f32 %v265_v6, %v264_v61  ;;  %v278_v21 = vadd.f32 %v277_v7, %v276_v63 }
  0x4a   :  { %v291_v22 = vrot.slane %v290_v8, 2  ;;  %v303_v23 = vrot.slane %v302_v9, 4  ;;  %v272_v25 = vrot.slane %v271_v14, 1  ;;  %v310_v30 = vrot.slane %v309_v17, 4 }
  0x4b   :  { %v285_v26 = vadd.f32 %v284_v15, %v283_v3  ;;  %v297_v29 = vadd.f32 %v296_v16, %v295_v4  ;;  %v279_v31 = vrot.slane %v278_v21, 1  ;;  %v316_v12 = vadd.f32 %v98_v11, %v96_v10 }
  0x4c   :  { %v292_v32 = vadd.f32 %v291_v22, %v290_v8  ;;  %v304_v33 = vadd.f32 %v303_v23, %v302_v9  ;;  %v273_v34 = vadd.f32 %v272_v25, %v271_v14  ;;  %v311_v18 = vadd.f32 %v310_v30, %v309_v17 }
  0x4d   :  { %v286_v35 = vrot.slane %v285_v26, 1  ;;  %v298_v36 = vrot.slane %v297_v29, 2  ;;  %v280_v38 = vadd.f32 %v279_v31, %v278_v21  ;;  %v317_v5 = vrot.slane %v316_v12, 4 }
  0x4e   :  { %v293_v24 = vrot.slane %v292_v32, 1  ;;  %v305_v39 = vrot.slane %v304_v33, 2  ;;  %v312_v42 = vrot.slane %v311_v18, 2  ;;  %v376_v43 = vsel %vm355_vm0, %v583_v37, %v579_v27 }
  0x4f   :  { %v287_v13 = vadd.f32 %v286_v35, %v285_v26  ;;  %v299_v41 = vadd.f32 %v298_v36, %v297_v29  ;;  %v318_v46 = vadd.f32 %v317_v5, %v316_v12  ;;  %v377_v47 = vsel %vm357_vm1, %v245_v53, %v376_v43 }
  0x50   :  { %v294_v19 = vadd.f32 %v293_v24, %v292_v32  ;;  %v306_v45 = vadd.f32 %v305_v39, %v304_v33  ;;  %v313_v28 = vadd.f32 %v312_v42, %v311_v18  ;;  %v378_v49 = vsel %vm359_vm2, %v259_v1, %v377_v47 }
  0x51   :  { %v300_v48 = vrot.slane %v299_v41, 1  ;;  %v383_v50 = vsel %vm355_vm0, %v585_v40, %v581_v62  ;;  %v319_v52 = vrot.slane %v318_v46, 2  ;;  %v379_v55 = vsel %vm361_vm3, %v273_v34, %v378_v49 }
  0x52   :  { %v307_v51 = vrot.slane %v306_v45, 1  ;;  %v384_v56 = vsel %vm357_vm1, %v252_v60, %v383_v50  ;;  %v314_v37 = vrot.slane %v313_v28, 1  ;;  %v380_v57 = vsel %vm363_vm4, %v287_v13, %v379_v55 }
  0x53   :  { %v301_v27 = vadd.f32 %v300_v48, %v299_v41  ;;  %v385_v53 = vsel %vm359_vm2, %v266_v20, %v384_v56  ;;  %v320_v59 = vadd.f32 %v319_v52, %v318_v46 }
  0x54   :  { %v308_v58 = vadd.f32 %v307_v51, %v306_v45  ;;  %v386_v61 = vsel %vm361_vm3, %v280_v38, %v385_v53  ;;  %v315_v63 = vadd.f32 %v314_v37, %v313_v28 }
  0x55   :  { %v381_v0 = vsel %vm365_vm5, %v301_v27, %v380_v57  ;;  %v387_v62 = vsel %vm363_vm4, %v294_v19, %v386_v61  ;;  %v321_v40 = vrot.slane %v320_v59, 1 }
  0x56   :  { %v382_v1 = vsel %vm367_vm6, %v315_v63, %v381_v0  ;;  %v388_v60 = vsel %vm365_vm5, %v308_v58, %v387_v62 }
  0x57   :  { %v322_v2 = vadd.f32 %v321_v40, %v320_v59  ;;  %v411_v3 = vmul.f32 %v382_v1, %v382_v1 }
  0x59   :  { %v389_v4 = vsel %vm367_vm6, %v322_v2, %v388_v60 }
  0x5a   :  { %v412_v6 = vmul.f32 %v389_v4, %v389_v4 }
  0x5c   :  { %v416_v7 = vadd.f32 %v412_v6, %v411_v3 }
  0x5e   :  { %417 = vadd.xlane.f32.xlu0 %v416_v7 }
  0xca   :  { %v415_v8 = vpop.xlane.xlu0 %414 }
  0xcb   :  { %v419_v9 = vmax.f32 %v415_v8, 1e-24 }
  0xcd   :  { %452 = vrsqrt.f32 %v419_v9 }
  0xd7   :  { %v453_v10 = vpop.eup %452 }
  0xd8   :  { %v423_v11 = vmul.f32 %v453_v10, %v568_v44  ;;  %v424_v14 = vmul.f32 %v453_v10, %v575_v54 }
  0xda   :  { %427 = vst [vmem:[#allocation6] sm:$0xff] %v423_v11  ;;  %428 = vst [vmem:[#allocation6 + $0x8] sm:$0xff] %v424_v14 }
  0xeb   :  { %v418_v15 = vpop.xlane.xlu0 %417 }
  0xec   :  { %v420_v16 = vmax.f32 %v418_v15, 1e-24 }
  0xee   :  { %454 = vrsqrt.f32 %v420_v16 }
  0xf8   :  { %v455_v17 = vpop.eup %454 }
  0xf9   :  { %v425_v20 = vmul.f32 %v455_v17, %v382_v1  ;;  %v426_v21 = vmul.f32 %v455_v17, %v389_v4 }
  0xfb   :  { %429 = vst [vmem:[#allocation6 + $0x10] sm:$0xff] %v425_v20  ;;  %430 = vst [vmem:[#allocation6 + $0x18] sm:$0xff] %v426_v21 }
  0xfc   :  { %489 = shalt.err (!%p486_p12)
}
  0xfd   :  { %s490_s24 = scalar_lea.hbm %s623_s1, 512 }
  0xfe   :  { %p491_p13 = scmp.ne.s32.totalorder %s623_s1, %s490_s24  ;;  %p494_p0 = scmp.lt.u32.totalorder %s490_s24, %s623_s1 }
 0x100   :  { %p496_p1 = pnand %p494_p0, %p491_p13 }
 0x102   :  { %499 = shalt.err (!%p496_p1)
}
 0x103   :  { %442 = dma.vmem_to_hbm [thread:$0]  %s437_s20, 512, %s623_s1, [#allocation5], %s505_s16, %s505_s16, %s506_s17  }
 0x104   :  { %502 = dma.done.wait [#allocation5], 512  }
 0x105   :  { %503 = vsyncadd [#allocation5], 4294966784 }
 0x106   :  { %446 = vsyncpa [#allocation4], 1 }
 0x107   :  { %447 = vsyncpa [#allocation5], 1 }

</bundles_post_ra>
